<compile_context>
chip_gen: v7x
topology: tpu7x:2x2x1
jax: 0.10.0
libtpu: 0.0.40
codegen_flags: <defaults>
</compile_context>

<pallas_src>
import numpy as np
import jax
import jax.numpy as jnp
from jax.experimental import pallas as pl
from jax.experimental.pallas import tpu as pltpu


def _round_up(x, m):
    return (x + m - 1) // m * m


def _mlp_kernel(x_ref, w1_ref, b1_ref, w2_ref, b2_ref, o_ref):
    # fc1: x @ W1 + b1, ReLU
    h = jnp.dot(x_ref[...], w1_ref[...], preferred_element_type=jnp.float32)
    h = jnp.maximum(h + b1_ref[...], 0.0)
    # fc2: h @ W2 + b2, tanh
    y = jnp.dot(h, w2_ref[...], preferred_element_type=jnp.float32)
    o_ref[...] = jnp.tanh(y + b2_ref[...]).astype(o_ref.dtype)


def individual_tanh_forward(x, w1, b1, w2, b2, *, batch_tile=256):
    """x: (B, state_size); w1: (state_size, fc1); b1: (fc1,);
       w2: (fc1, action_size); b2: (action_size,)  ->  (B, action_size)"""
    B, S = x.shape
    F1 = w1.shape[1]
    A = w2.shape[1]

    # Lane/sublane-friendly zero padding (numerically exact, see header).
    F1p = _round_up(F1, 128)
    Ap = _round_up(A, 128)
    TB = min(_round_up(B, 8), batch_tile)   # batch tile (multiple of 8)
    Bp = _round_up(B, TB)                   # padded batch (multiple of TB)

    x_p = x if Bp == B else jnp.pad(x, ((0, Bp - B), (0, 0)))
    w1_p = w1 if F1p == F1 else jnp.pad(w1, ((0, 0), (0, F1p - F1)))
    b1_p = (b1 if F1p == F1 else jnp.pad(b1, (0, F1p - F1))).reshape(1, F1p)
    w2_p = jnp.pad(w2, ((0, F1p - F1), (0, Ap - A)))
    b2_p = jnp.pad(b2, (0, Ap - A)).reshape(1, Ap)

    grid = (Bp // TB,)

    out = pl.pallas_call(
        _mlp_kernel,
        out_shape=jax.ShapeDtypeStruct((Bp, Ap), x.dtype),
        grid_spec=pltpu.PrefetchScalarGridSpec(
            num_scalar_prefetch=0,
            grid=grid,
            in_specs=[
                pl.BlockSpec((TB, S), lambda i: (i, 0)),    # activations: per tile
                pl.BlockSpec((S, F1p), lambda i: (0, 0)),   # W1: resident
                pl.BlockSpec((1, F1p), lambda i: (0, 0)),   # b1: resident
                pl.BlockSpec((F1p, Ap), lambda i: (0, 0)),  # W2: resident
                pl.BlockSpec((1, Ap), lambda i: (0, 0)),    # b2: resident
            ],
            out_specs=pl.BlockSpec((TB, Ap), lambda i: (i, 0)),
        ),
        compiler_params=pltpu.CompilerParams(
            dimension_semantics=("parallel",)),
    )(x_p, w1_p, b1_p, w2_p, b2_p)

    return out[:B, :A]


def init_params(key, state_size, action_size, fc1_units=50):
    """Deterministic init mimicking Individualtanh.reset_parameters()."""
    k1, k2, k3, k4 = jax.random.split(key, 4)
    # hidden_init uses weight.size()[0] == out_features (fc1_units) as "fan_in"
    # (intentional fidelity to the PyTorch module's quirk).
    lim1 = 1.0 / np.sqrt(fc1_units)
    # Stored as (in, out) = transposed PyTorch layout.
    w1 = jax.random.uniform(k1, (state_size, fc1_units), jnp.float32, -lim1, lim1)
    b1 = jax.random.uniform(k2, (fc1_units,), jnp.float32, -lim1, lim1)
    w2 = jax.random.uniform(k3, (fc1_units, action_size), jnp.float32, -0.003, 0.003)
    b2 = jax.random.uniform(k4, (action_size,), jnp.float32, -0.003, 0.003)
    return w1, b1, w2, b2


def _reference(x, w1, b1, w2, b2):
    return jnp.tanh(jnp.maximum(x @ w1 + b1, 0.0) @ w2 + b2)


if __name__ == "__main__":
    key = jax.random.PRNGKey(0)
    kx, kp, kx2 = jax.random.split(key, 3)

    # Small shapes consistent with the module defaults.
    batch = 8
    state_size = 33
    action_size = 4
    fc1_units = 50

    w1, b1, w2, b2 = init_params(kp, state_size, action_size, fc1_units)

    # Check 1: single-tile path (grid = (1,)).
    x = jax.random.normal(kx, (batch, state_size), jnp.float32)
    out = jax.block_until_ready(individual_tanh_forward(x, w1, b1, w2, b2))
    ref = _reference(x, w1, b1, w2, b2)
    np.testing.assert_allclose(np.asarray(out), np.asarray(ref), rtol=1e-5, atol=1e-5)

    # Check 2: multi-tile grid path with batch padding (exercises the pipeline).
    x2 = jax.random.normal(kx2, (130, state_size), jnp.float32)
    out2 = jax.block_until_ready(
        individual_tanh_forward(x2, w1, b1, w2, b2, batch_tile=64))
    ref2 = _reference(x2, w1, b1, w2, b2)
    np.testing.assert_allclose(np.asarray(out2), np.asarray(ref2), rtol=1e-5, atol=1e-5)

    print("KERNEL_OK")
</pallas_src>

<mosaic_0001>
module attributes {stable_mosaic.version = 11 : i64} {
  func.func @_mlp_kernel(%arg0: i32, %arg1: memref<8x33xf32, #tpu.memory_space<vmem>>, %arg2: memref<33x128xf32, #tpu.memory_space<vmem>>, %arg3: memref<1x128xf32, #tpu.memory_space<vmem>>, %arg4: memref<128x128xf32, #tpu.memory_space<vmem>>, %arg5: memref<1x128xf32, #tpu.memory_space<vmem>>, %arg6: memref<8x128xf32, #tpu.memory_space<vmem>>) attributes {dimension_semantics = [#tpu.dimension_semantics<parallel>], iteration_bounds = array<i64: 1>, scalar_prefetch = 0 : i64, scratch_operands = 0 : i64, tpu.core_type = #tpu.core_type<tc>, window_params = [{transform_indices = @transform_0, window_bounds = array<i64: 8, 33>}, {pipeline_mode = #tpu.pipeline_mode<synchronous>, transform_indices = @transform_1, window_bounds = array<i64: 33, 128>}, {pipeline_mode = #tpu.pipeline_mode<synchronous>, transform_indices = @transform_2, window_bounds = array<i64: 1, 128>}, {pipeline_mode = #tpu.pipeline_mode<synchronous>, transform_indices = @transform_3, window_bounds = array<i64: 128, 128>}, {pipeline_mode = #tpu.pipeline_mode<synchronous>, transform_indices = @transform_4, window_bounds = array<i64: 1, 128>}, {transform_indices = @transform_5, window_bounds = array<i64: 8, 128>}]} {
    %c0 = arith.constant 0 : index
    %c0_0 = arith.constant 0 : index
    %0 = vector.load %arg1[%c0, %c0_0] : memref<8x33xf32, #tpu.memory_space<vmem>>, vector<8x33xf32>
    %c0_1 = arith.constant 0 : index
    %c0_2 = arith.constant 0 : index
    %1 = vector.load %arg2[%c0_1, %c0_2] : memref<33x128xf32, #tpu.memory_space<vmem>>, vector<33x128xf32>
    %cst = arith.constant dense<0.000000e+00> : vector<8x128xf32>
    %2 = tpu.matmul %0, %1, %cst {dimension_numbers = #tpu.dot_dimension_numbers<[1], [0], [0], [1], [0, 0, 1, 1], [], []>} : vector<8x33xf32>, vector<33x128xf32>, vector<8x128xf32> -> vector<8x128xf32>
    %c0_3 = arith.constant 0 : index
    %c0_4 = arith.constant 0 : index
    %3 = vector.load %arg3[%c0_3, %c0_4] : memref<1x128xf32, #tpu.memory_space<vmem>>, vector<1x128xf32>
    %4 = vector.broadcast %3 : vector<1x128xf32> to vector<8x128xf32>
    %5 = arith.addf %2, %4 : vector<8x128xf32>
    %cst_5 = arith.constant 0.000000e+00 : f32
    %6 = vector.broadcast %cst_5 : f32 to vector<8x128xf32>
    %7 = arith.maximumf %5, %6 : vector<8x128xf32>
    %c0_6 = arith.constant 0 : index
    %c0_7 = arith.constant 0 : index
    %8 = vector.load %arg4[%c0_6, %c0_7] : memref<128x128xf32, #tpu.memory_space<vmem>>, vector<128x128xf32>
    %cst_8 = arith.constant dense<0.000000e+00> : vector<8x128xf32>
    %9 = tpu.matmul %7, %8, %cst_8 {dimension_numbers = #tpu.dot_dimension_numbers<[1], [0], [0], [1], [0, 0, 1, 1], [], []>} : vector<8x128xf32>, vector<128x128xf32>, vector<8x128xf32> -> vector<8x128xf32>
    %c0_9 = arith.constant 0 : index
    %c0_10 = arith.constant 0 : index
    %10 = vector.load %arg5[%c0_9, %c0_10] : memref<1x128xf32, #tpu.memory_space<vmem>>, vector<1x128xf32>
    %11 = vector.broadcast %10 : vector<1x128xf32> to vector<8x128xf32>
    %12 = arith.addf %9, %11 : vector<8x128xf32>
    %13 = math.tanh %12 : vector<8x128xf32>
    %c0_11 = arith.constant 0 : index
    %c0_12 = arith.constant 0 : index
    %14 = vector.load %arg6[%c0_11, %c0_12] : memref<8x128xf32, #tpu.memory_space<vmem>>, vector<8x128xf32>
    tpu.vector_store %arg6[%c0_11, %c0_12], %13 {strides = array<i32>} : memref<8x128xf32, #tpu.memory_space<vmem>>, vector<8x128xf32>,
    return
  }
  func.func @transform_0(%arg0: i32) -> (i32, i32) {
    %c0_i32 = arith.constant 0 : i32
    %c0_i32_0 = arith.constant 0 : i32
    return %arg0, %c0_i32 : i32, i32
  }
  func.func @transform_1(%arg0: i32) -> (i32, i32) {
    %c0_i32 = arith.constant 0 : i32
    %c0_i32_0 = arith.constant 0 : i32
    %c0_i32_1 = arith.constant 0 : i32
    return %c0_i32, %c0_i32_0 : i32, i32
  }
  func.func @transform_2(%arg0: i32) -> (i32, i32) {
    %c0_i32 = arith.constant 0 : i32
    %c0_i32_0 = arith.constant 0 : i32
    %c0_i32_1 = arith.constant 0 : i32
    return %c0_i32, %c0_i32_0 : i32, i32
  }
  func.func @transform_3(%arg0: i32) -> (i32, i32) {
    %c0_i32 = arith.constant 0 : i32
    %c0_i32_0 = arith.constant 0 : i32
    %c0_i32_1 = arith.constant 0 : i32
    return %c0_i32, %c0_i32_0 : i32, i32
  }
  func.func @transform_4(%arg0: i32) -> (i32, i32) {
    %c0_i32 = arith.constant 0 : i32
    %c0_i32_0 = arith.constant 0 : i32
    %c0_i32_1 = arith.constant 0 : i32
    return %c0_i32, %c0_i32_0 : i32, i32
  }
  func.func @transform_5(%arg0: i32) -> (i32, i32) {
    %c0_i32 = arith.constant 0 : i32
    %c0_i32_0 = arith.constant 0 : i32
    return %arg0, %c0_i32 : i32, i32
  }
}

</mosaic_0001>

<bundles_post_ra>
// kernel: tpu_custom_call.1
= control target key start
LH: loop header
LB: loop body
LE: loop exit
PB: predicated region body
PF: predicated region fallthrough
CT: control target
= control target key end

     0   :  { %10 = vsyncpa [#allocation3], 0  ;;  %s572_s0 = inlined_call_operand.hbm [shape: f32[8,33], index: 0, kind: input, shape index: {}]   ;;  %s573_s1 = inlined_call_operand.hbm [shape: f32[33,128], index: 1, kind: input, shape index: {}]   ;;  %s574_s2 = inlined_call_operand.vmem [shape: f32[1,128], index: 2, kind: input, shape index: {}]   ;;  %s575_s3 = inlined_call_operand.hbm [shape: f32[128,128], index: 3, kind: input, shape index: {}]   ;;  %s576_s4 = inlined_call_operand.vmem [shape: f32[1,128], index: 4, kind: input, shape index: {}]   ;;  %s577_s5 = inlined_call_operand.hbm [shape: f32[8,128], index: 5, kind: output, shape index: {}]  }
   0x1   :  { %11 = vsyncpa [#allocation6], 0 }
   0x2   :  { %12 = vsyncpa [#allocation4], 0  ;;  %s473_s18 = smov [#allocation5]   ;;  %s379_s22 = scalar_lea.hbm %s573_s1, 640 }
   0x3   :  { %s28_s19 = sshll.u32 %s473_s18, 4  ;;  %p380_p0 = scmp.ne.s32.totalorder %s573_s1, %s379_s22  ;;  %s29_s19 = int_to_ptr.vmem [resolvable:$true] %s28_s19 }
   0x4   :  { %p383_p1 = scmp.lt.u32.totalorder %s379_s22, %s573_s1 }
   0x6   :  { %p385_p2 = pnand %p383_p1, %p380_p0 }
   0x8   :  { %388 = shalt.err (!%p385_p2)
}
   0x9   :  { %s389_s27 = scalar_lea.vmem %s29_s19, 640  ;;  %p394_p4 = scmp.lt.s32.totalorder %s29_s19, %s29_s19 }
   0xa   :  { %p390_p3 = scmp.ne.s32.totalorder %s29_s19, %s389_s27  ;;  %p395_p5 = scmp.lt.s32.totalorder %s389_s27, %s389_s27 }
   0xc   :  { %p396_p6 = por %p395_p5, %p394_p4 }
   0xe   :  { %p397_p7 = pnand %p396_p6, %p390_p3 }
  0x10   :  { %400 = shalt.err (!%p397_p7)
}
  0x11   :  { %s474_s28 = smov 128   ;;  %s475_s29 = smov 8  }
  0x12   :  { %34 = dma.hbm_to_vmem [thread:$0]  %s573_s1, 640, %s29_s19, [#allocation6], %s474_s28, %s474_s28, %s475_s29  }
  0x13   :  { %s476_s7 = smov [#allocation2]   ;;  %s477_s9 = smov [#allocation7]  }
  0x14   :  { %s19_s8 = sshll.u32 %s476_s7, 4  ;;  %s42_s10 = sshll.u32 %s477_s9, 4  ;;  %s20_s8 = int_to_ptr.vmem [resolvable:$true] %s19_s8  ;;  %s43_s10 = int_to_ptr.vmem [resolvable:$true] %s42_s10 }
  0x15   :  { %s401_s13 = scalar_lea.hbm %s572_s0, 128 }
  0x16   :  { %p402_p8 = scmp.ne.s32.totalorder %s572_s0, %s401_s13  ;;  %p405_p9 = scmp.lt.u32.totalorder %s401_s13, %s572_s0 }
  0x18   :  { %p407_p10 = pnand %p405_p9, %p402_p8 }
  0x1a   :  { %410 = shalt.err (!%p407_p10)
}
  0x1b   :  { %s411_s1 = scalar_lea.vmem %s20_s8, 128  ;;  %p416_p12 = scmp.lt.s32.totalorder %s20_s8, %s20_s8 }
  0x1c   :  { %p412_p11 = scmp.ne.s32.totalorder %s20_s8, %s411_s1  ;;  %p417_p13 = scmp.lt.s32.totalorder %s411_s1, %s411_s1 }
  0x1e   :  { %p418_p0 = por %p417_p13, %p416_p12 }
  0x20   :  { %p419_p1 = pnand %p418_p0, %p412_p11 }
  0x22   :  { %422 = shalt.err (!%p419_p1)
}
  0x23   :  { %22 = dma.hbm_to_vmem [thread:$0]  %s572_s0, 128, %s20_s8, [#allocation3]  }
  0x24   :  { %s423_s22 = scalar_lea.hbm %s575_s3, 2048 }
  0x25   :  { %p424_p2 = scmp.ne.s32.totalorder %s575_s3, %s423_s22  ;;  %p427_p3 = scmp.lt.u32.totalorder %s423_s22, %s575_s3 }
  0x27   :  { %p429_p4 = pnand %p427_p3, %p424_p2 }
  0x29   :  { %432 = shalt.err (!%p429_p4)
}
  0x2a   :  { %s433_s27 = scalar_lea.vmem %s43_s10, 2048  ;;  %p438_p6 = scmp.lt.s32.totalorder %s43_s10, %s43_s10 }
  0x2b   :  { %p434_p5 = scmp.ne.s32.totalorder %s43_s10, %s433_s27  ;;  %p439_p7 = scmp.lt.s32.totalorder %s433_s27, %s433_s27 }
  0x2d   :  { %p440_p8 = por %p439_p7, %p438_p6 }
  0x2f   :  { %p441_p9 = pnand %p440_p8, %p434_p5 }
  0x31   :  { %444 = shalt.err (!%p441_p9)
}
  0x32   :  { %48 = dma.hbm_to_vmem [thread:$0]  %s575_s3, 2048, %s43_s10, [#allocation6], %s474_s28, %s474_s28, %s475_s29  }
  0x33   :  { %467 = dma.done.wait [#allocation3], 128  }
  0x34   :  { %468 = vsyncadd [#allocation3], 4294967168 }
  0x35   :  { %469 = dma.done.wait [#allocation6], 2688  }
  0x36   :  { %470 = vsyncadd [#allocation6], 4294964608  ;;  %v478_v0 = vmov 0.0|0.0   ;;  %vm479_vm0 = vmmov 0   ;;  %v480_v1 = vmov 0.0   ;;  %v61_v2 = vld [vmem:[#allocation5] sm:$0xff] }
  0x37   :  { %338 = vmatprep.subr.bf16.mxu0 %v478_v0  ;;  %300 = vmatprep.mubr.msk.f32.mxu0 %vm479_vm0, %v480_v1  ;;  %v62_v3 = vld [vmem:[#allocation5 + $0x8] sm:$0xff]  ;;  %v63_v4 = vld [vmem:[#allocation5 + $0x10] sm:$0xff]  ;;  %v64_v6 = vld [vmem:[#allocation5 + $0x18] sm:$0xff]  ;;  %vm77_vm1 = vcmask 1040384   ;;  %vm73_vm2 = vcmask 269312   ;;  %s481_s7 = smov [#allocation8]  }
  0x38   :  { %344 = vmatprep.subr.bf16.mxu1 %v478_v0  ;;  %335 = vmatprep.mubr.msk.f32.mxu1 %vm479_vm0, %v480_v1  ;;  %v339_v5 = vpack.c.bf16 %v62_v3, %v61_v2  ;;  %v152_v7 = vld [vmem:[#allocation7] sm:$0xff]  ;;  %v153_v8 = vld [vmem:[#allocation7 + $0x8] sm:$0xff]  ;;  %v154_v9 = vld [vmem:[#allocation7 + $0x10] sm:$0xff]  ;;  %v342_v10 = vpack.c.bf16 %v64_v6, %v63_v4  ;;  %s253_s8 = sshll.u32 %s481_s7, 4  ;;  %s254_s8 = int_to_ptr.vmem [resolvable:$true] %s253_s8 }
  0x39   :  { %v345_v11 = vpack.c.bf16 %v153_v8, %v152_v7  ;;  %v155_v12 = vld [vmem:[#allocation7 + $0x18] sm:$0xff]  ;;  %v156_v14 = vld [vmem:[#allocation7 + $0x20] sm:$0xff]  ;;  %v157_v15 = vld [vmem:[#allocation7 + $0x28] sm:$0xff]  ;;  %s445_s9 = scalar_lea.vmem %s254_s8, 128  ;;  %p450_p11 = scmp.lt.s32.totalorder %s254_s8, %s254_s8 }
  0x3a   :  { %340 = vmatpush3.bf16.msra.mxu0 %v339_v5  ;;  %v348_v13 = vpack.c.bf16 %v155_v12, %v154_v9  ;;  %v65_v16 = vld [vmem:[#allocation5 + $0x20] sm:$0x1]  ;;  %v60_v17 = vld [vmem:[#allocation2] sm:$0xff]  ;;  %v351_v18 = vpack.c.bf16 %v157_v15, %v156_v14  ;;  %v160_v22 = vld [vmem:[#allocation7 + $0x40] sm:$0xff]  ;;  %p446_p10 = scmp.ne.s32.totalorder %s254_s8, %s445_s9  ;;  %p451_p12 = scmp.lt.s32.totalorder %s445_s9, %s445_s9 }
  0x3b   :  { %341 = vmatprep.subr.bf16.mxu0 %v478_v0  ;;  %346 = vmatpush3.bf16.msra.mxu1 %v345_v11  ;;  %v158_v19 = vld [vmem:[#allocation7 + $0x30] sm:$0xff]  ;;  %v159_v20 = vld [vmem:[#allocation7 + $0x38] sm:$0xff]  ;;  %v161_v23 = vld [vmem:[#allocation7 + $0x48] sm:$0xff] }
  0x3c   :  { %347 = vmatprep.subr.bf16.mxu1 %v478_v0  ;;  %v354_v21 = vpack.c.bf16 %v159_v20, %v158_v19  ;;  %v357_v24 = vpack.c.bf16 %v161_v23, %v160_v22  ;;  %v162_v25 = vld [vmem:[#allocation7 + $0x50] sm:$0xff]  ;;  %v163_v26 = vld [vmem:[#allocation7 + $0x58] sm:$0xff]  ;;  %v164_v28 = vld [vmem:[#allocation7 + $0x60] sm:$0xff]  ;;  %p452_p13 = por %p451_p12, %p450_p11 }
  0x3d   :  { %v360_v27 = vpack.c.bf16 %v163_v26, %v162_v25  ;;  %v165_v29 = vld [vmem:[#allocation7 + $0x68] sm:$0xff]  ;;  %v166_v31 = vld [vmem:[#allocation7 + $0x70] sm:$0xff]  ;;  %v167_v32 = vld [vmem:[#allocation7 + $0x78] sm:$0xff] }
  0x3e   :  { %343 = vmatpush3.bf16.msra.mxu0 %v342_v10  ;;  %v363_v30 = vpack.c.bf16 %v165_v29, %v164_v28  ;;  %v366_v33 = vpack.c.bf16 %v167_v32, %v166_v31  ;;  %v263_v34 = vld [vmem:[%s574_s2] ss:$0 sm:$0xff]  ;;  %p453_p0 = pnand %p452_p13, %p446_p10 }
  0x3f   :  { %298 = vmatprep.subr.mxu0 %v480_v1  ;;  %349 = vmatpush3.bf16.msra.mxu1 %v348_v13  ;;  %v266_v39 = vld [vmem:[%s576_s4] ss:$0 sm:$0xff] }
  0x40   :  { %350 = vmatprep.subr.bf16.mxu1 %v478_v0 }
  0x42   :  { %299 = vmatpush3.msk.msra.mxu0 %vm77_vm1, %v65_v16 }
  0x43   :  { %301 = vmatmul.mubr.msk.f32.vlgmr.msra.gmra.mrb[0].mxu0 %vm73_vm2, %v60_v17  ;;  %352 = vmatpush3.bf16.msra.mxu1 %v351_v18 }
  0x44   :  { %353 = vmatprep.subr.bf16.mxu1 %v478_v0 }
  0x47   :  { %355 = vmatpush3.bf16.msra.mxu1 %v354_v21 }
  0x48   :  { %356 = vmatprep.subr.bf16.mxu1 %v478_v0 }
  0x4b   :  { %358 = vmatpush3.bf16.msra.mxu1 %v357_v24 }
  0x4c   :  { %359 = vmatprep.subr.bf16.mxu1 %v478_v0 }
  0x4f   :  { %361 = vmatpush3.bf16.msra.mxu1 %v360_v27 }
  0x50   :  { %362 = vmatprep.subr.bf16.mxu1 %v478_v0 }
  0x53   :  { %364 = vmatpush3.bf16.msra.mxu1 %v363_v30 }
  0x54   :  { %365 = vmatprep.subr.bf16.mxu1 %v478_v0 }
  0x57   :  { %367 = vmatpush3.bf16.msra.mxu1 %v366_v33 }
 0x116   :  { %v147_v35 = vpop.f32.mrb[0].mxu0 }
 0x117   :  { %v148_v36 = vadd.f32 %v263_v34, %v147_v35  ;;  %v302_v37 = vpop.f32.mrb[1].mxu0 }
 0x119   :  { %v151_v38 = vmax.f32 %v148_v36, 0.0 }
 0x11b   :  { %336 = vmatmul.mubr.f32.vlgmr.msra.gmra.mrb[0].mxu1 %v151_v38 }
 0x1ee   :  { %v241_v40 = vpop.f32.mrb[0].mxu1 }
 0x1ef   :  { %v242_v41 = vadd.f32 %v266_v39, %v241_v40  ;;  %v337_v42 = vpop.f32.mrb[1].mxu1 }
 0x1f1   :  { %377 = vtanh.f32 %v242_v41 }
 0x1fb   :  { %v378_v43 = vpop.eup %377 }
 0x1fc   :  { %246 = vst [vmem:[#allocation8] sm:$0xff] %v378_v43 }
 0x1fd   :  { %456 = shalt.err (!%p453_p0)
}
 0x1fe   :  { %s457_s4 = scalar_lea.hbm %s577_s5, 128 }
 0x1ff   :  { %p458_p1 = scmp.ne.s32.totalorder %s577_s5, %s457_s4  ;;  %p461_p2 = scmp.lt.u32.totalorder %s457_s4, %s577_s5 }
 0x201   :  { %p463_p3 = pnand %p461_p2, %p458_p1 }
 0x203   :  { %466 = shalt.err (!%p463_p3)
}
 0x204   :  { %256 = dma.vmem_to_hbm [thread:$0]  %s254_s8, 128, %s577_s5, [#allocation4]  }
 0x205   :  { %471 = dma.done.wait [#allocation4], 128  }
 0x206   :  { %472 = vsyncadd [#allocation4], 4294967168 }
 0x207   :  { %260 = vsyncpa [#allocation3], 1 }
 0x208   :  { %261 = vsyncpa [#allocation6], 1 }
 0x209   :  { %262 = vsyncpa [#allocation4], 1 }

</bundles_post_ra>
